<compile_context>
chip_gen: v5e
topology: v5e:2x2
jax: 0.10.0
libtpu: 0.0.40
codegen_flags: <defaults>
</compile_context>

<pallas_src>
import functools

import numpy as np
import jax
import jax.numpy as jnp
from jax.experimental import pallas as pl
from jax.experimental.pallas import tpu as pltpu


# ----------------------------- config ----------------------------------------
INPUT_DIM = 2           # "Exa2_2dim" -> 2-dimensional observed state
AUGMENT_DIM = 2         # augment_dim
AUG_INI_HIDDENDIM = 16  # aug_ini_hiddendim
HIDDEN_DIM = 32         # hidden_dim
NUM_LAYERS = 2          # first tanh layer + (NUM_LAYERS-1) tanh hidden layers
BATCH = 2
T_LEN = 8               # number of time points -> T_LEN - 1 Euler steps

_LANE = 128
_SUB = 8


def _round_up(x, m):
    return ((x + m - 1) // m) * m


# ----------------------------- Pallas kernel ---------------------------------
def _anode_kernel(misc_ref, bias_ref, w_ref, out_ref, *,
                  num_steps, num_hidden, n_pad, lane):
    """Whole forward in one kernel: 3 packed VMEM inputs, 1 VMEM output.

    misc_ref : (n_pad + 3*lane, lane) f32 rows = [y0 | Wa1 | Wa2 | W0]
    bias_ref : (8k, lane) f32 rows = [ba1, ba2, b0, b_hid..., bc, bout_total]
    w_ref    : (num_hidden + 2, lane, lane) bf16 pages =
               [W_hid..., Wc = dt*(W_out@W0), dt*W_out]
    """
    # Static, sublane-aligned row offsets inside the misc slab.
    r_y0 = 0
    r_wa1 = r_y0 + n_pad
    r_wa2 = r_wa1 + lane
    r_w0 = r_wa2 + lane

    y0 = misc_ref[r_y0:r_y0 + n_pad, :]
    wa1 = misc_ref[r_wa1:r_wa1 + lane, :]
    wa2 = misc_ref[r_wa2:r_wa2 + lane, :]
    w0 = misc_ref[r_w0:r_w0 + lane, :]

    ba1 = bias_ref[0:1, :]
    ba2 = bias_ref[1:2, :]
    b0 = bias_ref[2:3, :]
    bout_total = bias_ref[4 + num_hidden:5 + num_hidden, :]

    # ---- augment_net (runs once, f32).  Wa2/ba2 are padded at lane offset
    #      input_dim so "y0 + augnet(y0)" reproduces torch.cat((y0, y_aug), 2).
    ha = jnp.tanh(jnp.dot(y0, wa1, preferred_element_type=jnp.float32) + ba1)
    y_cat = y0 + jnp.dot(ha, wa2, preferred_element_type=jnp.float32) + ba2

    # ---- carried pre-activation u = y@W0 + b0 and running sum of last-hidden
    #      activations (the output Linear is applied once, after the loop).
    u = jnp.dot(y_cat, w0, preferred_element_type=jnp.float32) + b0
    h_sum = jnp.zeros((n_pad, lane), jnp.float32)

    # Hoist loop-invariant bias broadcasts (JAX does not CSE broadcast_in_dim).
    b_hid = [jnp.broadcast_to(bias_ref[3 + l:4 + l, :], (n_pad, lane))
             for l in range(num_hidden)]
    bc = jnp.broadcast_to(bias_ref[3 + num_hidden:4 + num_hidden, :],
                          (n_pad, lane))

    # Fixed-step Euler, fully unrolled (static, small trip count) so the LLO
    # scheduler can overlap consecutive steps' MXU/EUP latency.
    # TODO(synk): if a bundle dump shows Mosaic re-pushing the invariant 128x128
    # RHS weights each step, stage them once via pltpu.matmul_push_rhs and drive
    # matmul_acc_lhs / matmul_pop inside the loop (MRF on v5e/v6e, MRB on v7x).
    for _ in range(num_steps):
        h = jnp.tanh(u)
        for l in range(num_hidden):
            h = jnp.tanh(jnp.dot(h.astype(jnp.bfloat16), w_ref[l],
                                 preferred_element_type=jnp.float32) + b_hid[l])
        h_sum = h_sum + h                                  # off the serial chain
        # u_{k+1} = u_k + dt*(h@W_out + b_out)@W0, with dt folded into Wc/bc.
        u = u + jnp.dot(h.astype(jnp.bfloat16), w_ref[num_hidden],
                        preferred_element_type=jnp.float32) + bc

    # y_T = y_0 + (sum_k h_k) @ (dt*W_out) + num_steps*dt*b_out
    y = y_cat + jnp.dot(h_sum.astype(jnp.bfloat16), w_ref[num_hidden + 1],
                        preferred_element_type=jnp.float32) + bout_total
    # Padded batch rows (>= real N) carry garbage through the integration;
    # harmless, only rows [:N] and lanes [:input_dim] are ever read back.
    out_ref[...] = y.astype(out_ref.dtype)


# ----------------------------- one-time prep + forward ------------------------
def make_anode_forward(aug_params, ode_params, t, *, input_dim, augment_dim,
                       batch):
    """One-time prep: validate t, fold dt into weights, pack padded slabs.

    aug_params = [(Wa1 (D, AH), ba1 (AH,)), (Wa2 (AH, A), ba2 (A,))]
    ode_params = [(W0 (D+A, H), b0), (W_h (H, H), b_h) * (num_layers-1),
                  (W_out (H, D+A), b_out)]   -- weights stored (in, out).

    Returns a jitted forward(y0: (B, 1, input_dim)) -> (B, 1, input_dim); the
    per-call path is a single small y0 update into the misc slab + pallas_call.
    """
    d_state = input_dim + augment_dim
    (wa1, ba1), (wa2, ba2) = [(np.asarray(w, np.float32), np.asarray(b, np.float32))
                              for (w, b) in aug_params]
    ode_np = [(np.asarray(w, np.float32), np.asarray(b, np.float32))
              for (w, b) in ode_params]
    w0, b0 = ode_np[0]
    hid = ode_np[1:-1]
    w_out, b_out = ode_np[-1]

    AH = wa1.shape[1]
    H = w0.shape[1]
    num_hidden = len(hid)

    # basic_euler_ode_solver uses a single fixed dt = t[1]-t[0]; check uniform t
    # once here (never on the per-call path, no per-call device->host sync).
    t_host = np.asarray(t, dtype=np.float32)
    num_steps = int(t_host.shape[0]) - 1
    dts = np.diff(t_host)
    assert np.allclose(dts, dts[0], rtol=1e-5, atol=1e-6), "t must be uniformly spaced"
    dt = float(dts[0])

    lane = _LANE
    assert max(d_state, H, AH) <= lane, "dims above 128 need a tiled variant"
    n_pad = _round_up(max(batch, _SUB), _SUB)

    # --- f32 misc slab: rows [y0 | Wa1 | Wa2 | W0], lane width 128 ------------
    r_wa1 = n_pad
    r_wa2 = r_wa1 + lane
    r_w0 = r_wa2 + lane
    misc = np.zeros((r_w0 + lane, lane), np.float32)
    misc[r_wa1:r_wa1 + input_dim, :AH] = wa1
    # Wa2/ba2 placed at lane offset input_dim -> implements torch.cat.
    misc[r_wa2:r_wa2 + AH, input_dim:input_dim + augment_dim] = wa2
    misc[r_w0:r_w0 + d_state, :H] = w0

    # --- f32 bias slab: one (8k, 128) tile -------------------------------------
    b_rows = _round_up(5 + num_hidden, _SUB)
    bias = np.zeros((b_rows, lane), np.float32)
    bias[0, :AH] = ba1
    bias[1, input_dim:input_dim + augment_dim] = ba2
    bias[2, :H] = b0
    for l, (_, bl) in enumerate(hid):
        bias[3 + l, :H] = bl
    bias[3 + num_hidden, :H] = dt * (b_out @ w0)            # bc
    bias[4 + num_hidden, :d_state] = num_steps * dt * b_out  # total b_out term

    # --- bf16 weight slab: [W_hid..., Wc = dt*(W_out@W0), dt*W_out] ------------
    wslab = np.zeros((num_hidden + 2, lane, lane), np.float32)
    for l, (wl, _) in enumerate(hid):
        wslab[l, :H, :H] = wl
    wslab[num_hidden, :H, :H] = dt * (w_out @ w0)
    wslab[num_hidden + 1, :H, :d_state] = dt * w_out

    misc_base = jnp.asarray(misc)
    bias_slab = jnp.asarray(bias)
    w_slab = jnp.asarray(wslab, dtype=jnp.bfloat16)

    kernel = functools.partial(_anode_kernel, num_steps=num_steps,
                               num_hidden=num_hidden, n_pad=n_pad, lane=lane)

    # Everything resident in VMEM (< 0.4 MB), no grid: tiling would only add
    # per-step pipeline overhead to a latency-bound kernel.
    call = pl.pallas_call(
        kernel,
        out_shape=jax.ShapeDtypeStruct((n_pad, lane), jnp.float32),
        in_specs=[pl.BlockSpec(memory_space=pltpu.MemorySpace.VMEM)] * 3,
        out_specs=pl.BlockSpec(memory_space=pltpu.MemorySpace.VMEM),
    )

    @jax.jit
    def forward(y0):
        B, one, D = y0.shape
        assert D == input_dim and B * one <= n_pad
        n = B * one
        m = misc_base.at[:n, :D].set(y0.reshape(n, D).astype(jnp.float32))
        out_pad = call(m, bias_slab, w_slab)
        # out[-1][:, :, :input_dim]
        return out_pad[:n, :input_dim].reshape(B, one, input_dim)

    return forward


# ----------------------------- pure-JAX reference (full f32) ------------------
def _reference_forward(y0, t, aug_params, ode_params, input_dim):
    (wa1, ba1), (wa2, ba2) = aug_params
    y_aug = jnp.tanh(y0 @ wa1 + ba1) @ wa2 + ba2
    y = jnp.concatenate([y0, y_aug], axis=2)
    dt = t[1] - t[0]

    def f(y):
        h = jnp.tanh(y @ ode_params[0][0] + ode_params[0][1])
        for l in range(1, len(ode_params) - 1):
            h = jnp.tanh(h @ ode_params[l][0] + ode_params[l][1])
        return h @ ode_params[-1][0] + ode_params[-1][1]

    for _ in range(int(t.shape[0]) - 1):
        y = y + f(y) * dt
    return y[:, :, :input_dim]


# ----------------------------- main -------------------------------------------
if __name__ == "__main__":
    key = jax.random.PRNGKey(0)
    d_state = INPUT_DIM + AUGMENT_DIM

    def init_linear(k, fan_in, fan_out):
        kw, kb = jax.random.split(k)
        scale = 1.0 / jnp.sqrt(jnp.float32(fan_in))
        W = jax.random.uniform(kw, (fan_in, fan_out), jnp.float32, -scale, scale)
        b = jax.random.uniform(kb, (fan_out,), jnp.float32, -scale, scale)
        return W, b

    # augment_net: Linear(D, AH) -> Tanh -> Linear(AH, A)
    key, k1, k2 = jax.random.split(key, 3)
    aug_params = [init_linear(k1, INPUT_DIM, AUG_INI_HIDDENDIM),
                  init_linear(k2, AUG_INI_HIDDENDIM, AUGMENT_DIM)]

    # AugmentedODEFunc: Linear(D+A,H)->Tanh -> [Linear(H,H)->Tanh]*(L-1) -> Linear(H,D+A)
    dims = [d_state] + [HIDDEN_DIM] * NUM_LAYERS + [d_state]
    ode_params = []
    for i in range(len(dims) - 1):
        key, kl = jax.random.split(key)
        ode_params.append(init_linear(kl, dims[i], dims[i + 1]))

    # deterministic inputs
    key, ky = jax.random.split(key)
    y0 = jax.random.normal(ky, (BATCH, 1, INPUT_DIM), jnp.float32)
    t = jnp.linspace(0.0, 1.0, T_LEN, dtype=jnp.float32)

    forward = make_anode_forward(aug_params, ode_params, t,
                                 input_dim=INPUT_DIM,
                                 augment_dim=AUGMENT_DIM,
                                 batch=BATCH)
    out = forward(y0)
    out = jax.block_until_ready(out)

    ref = _reference_forward(y0, t, aug_params, ode_params, INPUT_DIM)
    assert out.shape == (BATCH, 1, INPUT_DIM)
    # Kernel uses bf16 MXU operands (f32 accumulation) and an algebraically
    # equivalent dt-folded / pre-activation-carried Euler recurrence; compare
    # against the full-f32 reference at mixed-precision tolerance.
    assert jnp.allclose(out, ref, atol=2e-2, rtol=2e-2), "mismatch vs JAX reference"

    print("KERNEL_OK")
</pallas_src>

<mosaic_0001>
module attributes {stable_mosaic.version = 11 : i64} {
  func.func @_anode_kernel(%arg0: memref<392x128xf32, #tpu.memory_space<vmem>>, %arg1: memref<8x128xf32, #tpu.memory_space<vmem>>, %arg2: memref<3x128x128xbf16, #tpu.memory_space<vmem>>, %arg3: memref<8x128xf32, #tpu.memory_space<vmem>>) attributes {dimension_semantics = [], scalar_prefetch = 0 : i64, scratch_operands = 0 : i64, tpu.core_type = #tpu.core_type<tc>} {
    %c0 = arith.constant 0 : index
    %c0_0 = arith.constant 0 : index
    %0 = vector.load %arg0[%c0, %c0_0] : memref<392x128xf32, #tpu.memory_space<vmem>>, vector<8x128xf32>
    %c8 = arith.constant 8 : index
    %c0_1 = arith.constant 0 : index
    %1 = vector.load %arg0[%c8, %c0_1] : memref<392x128xf32, #tpu.memory_space<vmem>>, vector<128x128xf32>
    %c136 = arith.constant 136 : index
    %c0_2 = arith.constant 0 : index
    %2 = vector.load %arg0[%c136, %c0_2] : memref<392x128xf32, #tpu.memory_space<vmem>>, vector<128x128xf32>
    %c264 = arith.constant 264 : index
    %c0_3 = arith.constant 0 : index
    %3 = vector.load %arg0[%c264, %c0_3] : memref<392x128xf32, #tpu.memory_space<vmem>>, vector<128x128xf32>
    %c0_4 = arith.constant 0 : index
    %c0_5 = arith.constant 0 : index
    %4 = vector.load %arg1[%c0_4, %c0_5] : memref<8x128xf32, #tpu.memory_space<vmem>>, vector<1x128xf32>
    %c1 = arith.constant 1 : index
    %c0_6 = arith.constant 0 : index
    %5 = vector.load %arg1[%c1, %c0_6] : memref<8x128xf32, #tpu.memory_space<vmem>>, vector<1x128xf32>
    %c2 = arith.constant 2 : index
    %c0_7 = arith.constant 0 : index
    %6 = vector.load %arg1[%c2, %c0_7] : memref<8x128xf32, #tpu.memory_space<vmem>>, vector<1x128xf32>
    %c5 = arith.constant 5 : index
    %c0_8 = arith.constant 0 : index
    %7 = vector.load %arg1[%c5, %c0_8] : memref<8x128xf32, #tpu.memory_space<vmem>>, vector<1x128xf32>
    %cst = arith.constant dense<0.000000e+00> : vector<8x128xf32>
    %8 = tpu.matmul %0, %1, %cst {dimension_numbers = #tpu.dot_dimension_numbers<[1], [0], [0], [1], [0, 0, 1, 1], [], []>} : vector<8x128xf32>, vector<128x128xf32>, vector<8x128xf32> -> vector<8x128xf32>
    %9 = vector.broadcast %4 : vector<1x128xf32> to vector<8x128xf32>
    %10 = arith.addf %8, %9 : vector<8x128xf32>
    %11 = math.tanh %10 : vector<8x128xf32>
    %cst_9 = arith.constant dense<0.000000e+00> : vector<8x128xf32>
    %12 = tpu.matmul %11, %2, %cst_9 {dimension_numbers = #tpu.dot_dimension_numbers<[1], [0], [0], [1], [0, 0, 1, 1], [], []>} : vector<8x128xf32>, vector<128x128xf32>, vector<8x128xf32> -> vector<8x128xf32>
    %13 = arith.addf %0, %12 : vector<8x128xf32>
    %14 = vector.broadcast %5 : vector<1x128xf32> to vector<8x128xf32>
    %15 = arith.addf %13, %14 : vector<8x128xf32>
    %cst_10 = arith.constant dense<0.000000e+00> : vector<8x128xf32>
    %16 = tpu.matmul %15, %3, %cst_10 {dimension_numbers = #tpu.dot_dimension_numbers<[1], [0], [0], [1], [0, 0, 1, 1], [], []>} : vector<8x128xf32>, vector<128x128xf32>, vector<8x128xf32> -> vector<8x128xf32>
    %17 = vector.broadcast %6 : vector<1x128xf32> to vector<8x128xf32>
    %18 = arith.addf %16, %17 : vector<8x128xf32>
    %cst_11 = arith.constant 0.000000e+00 : f32
    %19 = vector.broadcast %cst_11 : f32 to vector<8x128xf32>
    %c3 = arith.constant 3 : index
    %c0_12 = arith.constant 0 : index
    %20 = vector.load %arg1[%c3, %c0_12] : memref<8x128xf32, #tpu.memory_space<vmem>>, vector<1x128xf32>
    %21 = vector.shape_cast %20 : vector<1x128xf32> to vector<1x128xf32>
    %22 = vector.broadcast %21 : vector<1x128xf32> to vector<8x128xf32>
    %c4 = arith.constant 4 : index
    %c0_13 = arith.constant 0 : index
    %23 = vector.load %arg1[%c4, %c0_13] : memref<8x128xf32, #tpu.memory_space<vmem>>, vector<1x128xf32>
    %24 = vector.shape_cast %23 : vector<1x128xf32> to vector<1x128xf32>
    %25 = vector.broadcast %24 : vector<1x128xf32> to vector<8x128xf32>
    %26 = math.tanh %18 : vector<8x128xf32>
    %27 = arith.truncf %26 : vector<8x128xf32> to vector<8x128xbf16>
    %c0_14 = arith.constant 0 : index
    %c0_15 = arith.constant 0 : index
    %c0_16 = arith.constant 0 : index
    %28 = vector.load %arg2[%c0_14, %c0_15, %c0_16] : memref<3x128x128xbf16, #tpu.memory_space<vmem>>, vector<1x128x128xbf16>
    %29 = vector.shape_cast %28 : vector<1x128x128xbf16> to vector<128x128xbf16>
    %cst_17 = arith.constant dense<0.000000e+00> : vector<8x128xf32>
    %30 = tpu.matmul %27, %29, %cst_17 {dimension_numbers = #tpu.dot_dimension_numbers<[1], [0], [0], [1], [0, 0, 1, 1], [], []>} : vector<8x128xbf16>, vector<128x128xbf16>, vector<8x128xf32> -> vector<8x128xf32>
    %31 = arith.addf %30, %22 : vector<8x128xf32>
    %32 = math.tanh %31 : vector<8x128xf32>
    %33 = arith.addf %19, %32 : vector<8x128xf32>
    %34 = arith.truncf %32 : vector<8x128xf32> to vector<8x128xbf16>
    %c1_18 = arith.constant 1 : index
    %c0_19 = arith.constant 0 : index
    %c0_20 = arith.constant 0 : index
    %35 = vector.load %arg2[%c1_18, %c0_19, %c0_20] : memref<3x128x128xbf16, #tpu.memory_space<vmem>>, vector<1x128x128xbf16>
    %36 = vector.shape_cast %35 : vector<1x128x128xbf16> to vector<128x128xbf16>
    %cst_21 = arith.constant dense<0.000000e+00> : vector<8x128xf32>
    %37 = tpu.matmul %34, %36, %cst_21 {dimension_numbers = #tpu.dot_dimension_numbers<[1], [0], [0], [1], [0, 0, 1, 1], [], []>} : vector<8x128xbf16>, vector<128x128xbf16>, vector<8x128xf32> -> vector<8x128xf32>
    %38 = arith.addf %18, %37 : vector<8x128xf32>
    %39 = arith.addf %38, %25 : vector<8x128xf32>
    %40 = math.tanh %39 : vector<8x128xf32>
    %41 = arith.truncf %40 : vector<8x128xf32> to vector<8x128xbf16>
    %c0_22 = arith.constant 0 : index
    %c0_23 = arith.constant 0 : index
    %c0_24 = arith.constant 0 : index
    %42 = vector.load %arg2[%c0_22, %c0_23, %c0_24] : memref<3x128x128xbf16, #tpu.memory_space<vmem>>, vector<1x128x128xbf16>
    %43 = vector.shape_cast %42 : vector<1x128x128xbf16> to vector<128x128xbf16>
    %cst_25 = arith.constant dense<0.000000e+00> : vector<8x128xf32>
    %44 = tpu.matmul %41, %43, %cst_25 {dimension_numbers = #tpu.dot_dimension_numbers<[1], [0], [0], [1], [0, 0, 1, 1], [], []>} : vector<8x128xbf16>, vector<128x128xbf16>, vector<8x128xf32> -> vector<8x128xf32>
    %45 = arith.addf %44, %22 : vector<8x128xf32>
    %46 = math.tanh %45 : vector<8x128xf32>
    %47 = arith.addf %33, %46 : vector<8x128xf32>
    %48 = arith.truncf %46 : vector<8x128xf32> to vector<8x128xbf16>
    %c1_26 = arith.constant 1 : index
    %c0_27 = arith.constant 0 : index
    %c0_28 = arith.constant 0 : index
    %49 = vector.load %arg2[%c1_26, %c0_27, %c0_28] : memref<3x128x128xbf16, #tpu.memory_space<vmem>>, vector<1x128x128xbf16>
    %50 = vector.shape_cast %49 : vector<1x128x128xbf16> to vector<128x128xbf16>
    %cst_29 = arith.constant dense<0.000000e+00> : vector<8x128xf32>
    %51 = tpu.matmul %48, %50, %cst_29 {dimension_numbers = #tpu.dot_dimension_numbers<[1], [0], [0], [1], [0, 0, 1, 1], [], []>} : vector<8x128xbf16>, vector<128x128xbf16>, vector<8x128xf32> -> vector<8x128xf32>
    %52 = arith.addf %39, %51 : vector<8x128xf32>
    %53 = arith.addf %52, %25 : vector<8x128xf32>
    %54 = math.tanh %53 : vector<8x128xf32>
    %55 = arith.truncf %54 : vector<8x128xf32> to vector<8x128xbf16>
    %c0_30 = arith.constant 0 : index
    %c0_31 = arith.constant 0 : index
    %c0_32 = arith.constant 0 : index
    %56 = vector.load %arg2[%c0_30, %c0_31, %c0_32] : memref<3x128x128xbf16, #tpu.memory_space<vmem>>, vector<1x128x128xbf16>
    %57 = vector.shape_cast %56 : vector<1x128x128xbf16> to vector<128x128xbf16>
    %cst_33 = arith.constant dense<0.000000e+00> : vector<8x128xf32>
    %58 = tpu.matmul %55, %57, %cst_33 {dimension_numbers = #tpu.dot_dimension_numbers<[1], [0], [0], [1], [0, 0, 1, 1], [], []>} : vector<8x128xbf16>, vector<128x128xbf16>, vector<8x128xf32> -> vector<8x128xf32>
    %59 = arith.addf %58, %22 : vector<8x128xf32>
    %60 = math.tanh %59 : vector<8x128xf32>
    %61 = arith.addf %47, %60 : vector<8x128xf32>
    %62 = arith.truncf %60 : vector<8x128xf32> to vector<8x128xbf16>
    %c1_34 = arith.constant 1 : index
    %c0_35 = arith.constant 0 : index
    %c0_36 = arith.constant 0 : index
    %63 = vector.load %arg2[%c1_34, %c0_35, %c0_36] : memref<3x128x128xbf16, #tpu.memory_space<vmem>>, vector<1x128x128xbf16>
    %64 = vector.shape_cast %63 : vector<1x128x128xbf16> to vector<128x128xbf16>
    %cst_37 = arith.constant dense<0.000000e+00> : vector<8x128xf32>
    %65 = tpu.matmul %62, %64, %cst_37 {dimension_numbers = #tpu.dot_dimension_numbers<[1], [0], [0], [1], [0, 0, 1, 1], [], []>} : vector<8x128xbf16>, vector<128x128xbf16>, vector<8x128xf32> -> vector<8x128xf32>
    %66 = arith.addf %53, %65 : vector<8x128xf32>
    %67 = arith.addf %66, %25 : vector<8x128xf32>
    %68 = math.tanh %67 : vector<8x128xf32>
    %69 = arith.truncf %68 : vector<8x128xf32> to vector<8x128xbf16>
    %c0_38 = arith.constant 0 : index
    %c0_39 = arith.constant 0 : index
    %c0_40 = arith.constant 0 : index
    %70 = vector.load %arg2[%c0_38, %c0_39, %c0_40] : memref<3x128x128xbf16, #tpu.memory_space<vmem>>, vector<1x128x128xbf16>
    %71 = vector.shape_cast %70 : vector<1x128x128xbf16> to vector<128x128xbf16>
    %cst_41 = arith.constant dense<0.000000e+00> : vector<8x128xf32>
    %72 = tpu.matmul %69, %71, %cst_41 {dimension_numbers = #tpu.dot_dimension_numbers<[1], [0], [0], [1], [0, 0, 1, 1], [], []>} : vector<8x128xbf16>, vector<128x128xbf16>, vector<8x128xf32> -> vector<8x128xf32>
    %73 = arith.addf %72, %22 : vector<8x128xf32>
    %74 = math.tanh %73 : vector<8x128xf32>
    %75 = arith.addf %61, %74 : vector<8x128xf32>
    %76 = arith.truncf %74 : vector<8x128xf32> to vector<8x128xbf16>
    %c1_42 = arith.constant 1 : index
    %c0_43 = arith.constant 0 : index
    %c0_44 = arith.constant 0 : index
    %77 = vector.load %arg2[%c1_42, %c0_43, %c0_44] : memref<3x128x128xbf16, #tpu.memory_space<vmem>>, vector<1x128x128xbf16>
    %78 = vector.shape_cast %77 : vector<1x128x128xbf16> to vector<128x128xbf16>
    %cst_45 = arith.constant dense<0.000000e+00> : vector<8x128xf32>
    %79 = tpu.matmul %76, %78, %cst_45 {dimension_numbers = #tpu.dot_dimension_numbers<[1], [0], [0], [1], [0, 0, 1, 1], [], []>} : vector<8x128xbf16>, vector<128x128xbf16>, vector<8x128xf32> -> vector<8x128xf32>
    %80 = arith.addf %67, %79 : vector<8x128xf32>
    %81 = arith.addf %80, %25 : vector<8x128xf32>
    %82 = math.tanh %81 : vector<8x128xf32>
    %83 = arith.truncf %82 : vector<8x128xf32> to vector<8x128xbf16>
    %c0_46 = arith.constant 0 : index
    %c0_47 = arith.constant 0 : index
    %c0_48 = arith.constant 0 : index
    %84 = vector.load %arg2[%c0_46, %c0_47, %c0_48] : memref<3x128x128xbf16, #tpu.memory_space<vmem>>, vector<1x128x128xbf16>
    %85 = vector.shape_cast %84 : vector<1x128x128xbf16> to vector<128x128xbf16>
    %cst_49 = arith.constant dense<0.000000e+00> : vector<8x128xf32>
    %86 = tpu.matmul %83, %85, %cst_49 {dimension_numbers = #tpu.dot_dimension_numbers<[1], [0], [0], [1], [0, 0, 1, 1], [], []>} : vector<8x128xbf16>, vector<128x128xbf16>, vector<8x128xf32> -> vector<8x128xf32>
    %87 = arith.addf %86, %22 : vector<8x128xf32>
    %88 = math.tanh %87 : vector<8x128xf32>
    %89 = arith.addf %75, %88 : vector<8x128xf32>
    %90 = arith.truncf %88 : vector<8x128xf32> to vector<8x128xbf16>
    %c1_50 = arith.constant 1 : index
    %c0_51 = arith.constant 0 : index
    %c0_52 = arith.constant 0 : index
    %91 = vector.load %arg2[%c1_50, %c0_51, %c0_52] : memref<3x128x128xbf16, #tpu.memory_space<vmem>>, vector<1x128x128xbf16>
    %92 = vector.shape_cast %91 : vector<1x128x128xbf16> to vector<128x128xbf16>
    %cst_53 = arith.constant dense<0.000000e+00> : vector<8x128xf32>
    %93 = tpu.matmul %90, %92, %cst_53 {dimension_numbers = #tpu.dot_dimension_numbers<[1], [0], [0], [1], [0, 0, 1, 1], [], []>} : vector<8x128xbf16>, vector<128x128xbf16>, vector<8x128xf32> -> vector<8x128xf32>
    %94 = arith.addf %81, %93 : vector<8x128xf32>
    %95 = arith.addf %94, %25 : vector<8x128xf32>
    %96 = math.tanh %95 : vector<8x128xf32>
    %97 = arith.truncf %96 : vector<8x128xf32> to vector<8x128xbf16>
    %c0_54 = arith.constant 0 : index
    %c0_55 = arith.constant 0 : index
    %c0_56 = arith.constant 0 : index
    %98 = vector.load %arg2[%c0_54, %c0_55, %c0_56] : memref<3x128x128xbf16, #tpu.memory_space<vmem>>, vector<1x128x128xbf16>
    %99 = vector.shape_cast %98 : vector<1x128x128xbf16> to vector<128x128xbf16>
    %cst_57 = arith.constant dense<0.000000e+00> : vector<8x128xf32>
    %100 = tpu.matmul %97, %99, %cst_57 {dimension_numbers = #tpu.dot_dimension_numbers<[1], [0], [0], [1], [0, 0, 1, 1], [], []>} : vector<8x128xbf16>, vector<128x128xbf16>, vector<8x128xf32> -> vector<8x128xf32>
    %101 = arith.addf %100, %22 : vector<8x128xf32>
    %102 = math.tanh %101 : vector<8x128xf32>
    %103 = arith.addf %89, %102 : vector<8x128xf32>
    %104 = arith.truncf %102 : vector<8x128xf32> to vector<8x128xbf16>
    %c1_58 = arith.constant 1 : index
    %c0_59 = arith.constant 0 : index
    %c0_60 = arith.constant 0 : index
    %105 = vector.load %arg2[%c1_58, %c0_59, %c0_60] : memref<3x128x128xbf16, #tpu.memory_space<vmem>>, vector<1x128x128xbf16>
    %106 = vector.shape_cast %105 : vector<1x128x128xbf16> to vector<128x128xbf16>
    %cst_61 = arith.constant dense<0.000000e+00> : vector<8x128xf32>
    %107 = tpu.matmul %104, %106, %cst_61 {dimension_numbers = #tpu.dot_dimension_numbers<[1], [0], [0], [1], [0, 0, 1, 1], [], []>} : vector<8x128xbf16>, vector<128x128xbf16>, vector<8x128xf32> -> vector<8x128xf32>
    %108 = arith.addf %95, %107 : vector<8x128xf32>
    %109 = arith.addf %108, %25 : vector<8x128xf32>
    %110 = math.tanh %109 : vector<8x128xf32>
    %111 = arith.truncf %110 : vector<8x128xf32> to vector<8x128xbf16>
    %c0_62 = arith.constant 0 : index
    %c0_63 = arith.constant 0 : index
    %c0_64 = arith.constant 0 : index
    %112 = vector.load %arg2[%c0_62, %c0_63, %c0_64] : memref<3x128x128xbf16, #tpu.memory_space<vmem>>, vector<1x128x128xbf16>
    %113 = vector.shape_cast %112 : vector<1x128x128xbf16> to vector<128x128xbf16>
    %cst_65 = arith.constant dense<0.000000e+00> : vector<8x128xf32>
    %114 = tpu.matmul %111, %113, %cst_65 {dimension_numbers = #tpu.dot_dimension_numbers<[1], [0], [0], [1], [0, 0, 1, 1], [], []>} : vector<8x128xbf16>, vector<128x128xbf16>, vector<8x128xf32> -> vector<8x128xf32>
    %115 = arith.addf %114, %22 : vector<8x128xf32>
    %116 = math.tanh %115 : vector<8x128xf32>
    %117 = arith.addf %103, %116 : vector<8x128xf32>
    %118 = arith.truncf %117 : vector<8x128xf32> to vector<8x128xbf16>
    %c2_66 = arith.constant 2 : index
    %c0_67 = arith.constant 0 : index
    %c0_68 = arith.constant 0 : index
    %119 = vector.load %arg2[%c2_66, %c0_67, %c0_68] : memref<3x128x128xbf16, #tpu.memory_space<vmem>>, vector<1x128x128xbf16>
    %120 = vector.shape_cast %119 : vector<1x128x128xbf16> to vector<128x128xbf16>
    %cst_69 = arith.constant dense<0.000000e+00> : vector<8x128xf32>
    %121 = tpu.matmul %118, %120, %cst_69 {dimension_numbers = #tpu.dot_dimension_numbers<[1], [0], [0], [1], [0, 0, 1, 1], [], []>} : vector<8x128xbf16>, vector<128x128xbf16>, vector<8x128xf32> -> vector<8x128xf32>
    %122 = arith.addf %15, %121 : vector<8x128xf32>
    %123 = vector.broadcast %7 : vector<1x128xf32> to vector<8x128xf32>
    %124 = arith.addf %122, %123 : vector<8x128xf32>
    %c0_70 = arith.constant 0 : index
    %c0_71 = arith.constant 0 : index
    %125 = vector.load %arg3[%c0_70, %c0_71] : memref<8x128xf32, #tpu.memory_space<vmem>>, vector<8x128xf32>
    tpu.vector_store %arg3[%c0_70, %c0_71], %124 {strides = array<i32>} : memref<8x128xf32, #tpu.memory_space<vmem>>, vector<8x128xf32>,
    return
  }
}

</mosaic_0001>

<bundles_post_ra>
// kernel: forward.1
= control target key start
LH: loop header
LB: loop body
LE: loop exit
PB: predicated region body
PF: predicated region fallthrough
CT: control target
= control target key end

     0   :  { %s1177_s0 = inlined_call_operand.vmem [shape: f32[392,128], index: 0, kind: input, shape index: {}]   ;;  %s1178_s1 = inlined_call_operand.vmem [shape: f32[8,128], index: 1, kind: input, shape index: {}]   ;;  %s1179_s2 = inlined_call_operand.vmem [shape: bf16[3,128,128], index: 2, kind: input, shape index: {}]   ;;  %s1180_s3 = inlined_call_operand.vmem [shape: f32[8,128], index: 3, kind: output, shape index: {}]  }
   0x1   :  { %v30_v0 = vld [vmem:[%s1177_s0 + $0x80] sm:$0xff]  ;;  %v29_v1 = vld [vmem:[%s1177_s0 + $0x78] sm:$0xff]  ;;  %v28_v2 = vld [vmem:[%s1177_s0 + $0x70] sm:$0xff] }
   0x2   :  { %68 = vmatpush.msra.mxu0 %v30_v0  ;;  %v27_v3 = vld [vmem:[%s1177_s0 + $0x68] sm:$0xff]  ;;  %v46_v4 = vld [vmem:[%s1177_s0 + $0x100] sm:$0xff]  ;;  %v45_v6 = vld [vmem:[%s1177_s0 + $0xf8] sm:$0xff] }
   0x3   :  { %v26_v5 = vld [vmem:[%s1177_s0 + $0x60] sm:$0xff]  ;;  %89 = vmatpush.msra.mxu1 %v46_v4  ;;  %v44_v7 = vld [vmem:[%s1177_s0 + $0xf0] sm:$0xff]  ;;  %v25_v8 = vld [vmem:[%s1177_s0 + $0x58] sm:$0xff] }
   0x4   :  { %69 = vmatpush.msra.mxu0 %v29_v1  ;;  %v24_v9 = vld [vmem:[%s1177_s0 + $0x50] sm:$0xff]  ;;  %v43_v10 = vld [vmem:[%s1177_s0 + $0xe8] sm:$0xff]  ;;  %v42_v11 = vld [vmem:[%s1177_s0 + $0xe0] sm:$0xff] }
   0x5   :  { %90 = vmatpush.msra.mxu1 %v45_v6  ;;  %v23_v12 = vld [vmem:[%s1177_s0 + $0x48] sm:$0xff]  ;;  %v41_v13 = vld [vmem:[%s1177_s0 + $0xd8] sm:$0xff]  ;;  %v22_v14 = vld [vmem:[%s1177_s0 + $0x40] sm:$0xff] }
   0x6   :  { %70 = vmatpush.msra.mxu0 %v28_v2  ;;  %v40_v15 = vld [vmem:[%s1177_s0 + $0xd0] sm:$0xff]  ;;  %v21_v16 = vld [vmem:[%s1177_s0 + $0x38] sm:$0xff]  ;;  %v39_v17 = vld [vmem:[%s1177_s0 + $0xc8] sm:$0xff] }
   0x7   :  { %91 = vmatpush.msra.mxu1 %v44_v7  ;;  %v20_v18 = vld [vmem:[%s1177_s0 + $0x30] sm:$0xff]  ;;  %v38_v19 = vld [vmem:[%s1177_s0 + $0xc0] sm:$0xff]  ;;  %v19_v20 = vld [vmem:[%s1177_s0 + $0x28] sm:$0xff] }
   0x8   :  { %71 = vmatpush.msra.mxu0 %v27_v3  ;;  %v37_v21 = vld [vmem:[%s1177_s0 + $0xb8] sm:$0xff]  ;;  %v18_v22 = vld [vmem:[%s1177_s0 + $0x20] sm:$0xff]  ;;  %v36_v23 = vld [vmem:[%s1177_s0 + $0xb0] sm:$0xff] }
   0x9   :  { %92 = vmatpush.msra.mxu1 %v43_v10  ;;  %v17_v24 = vld [vmem:[%s1177_s0 + $0x18] sm:$0xff]  ;;  %v16_v25 = vld [vmem:[%s1177_s0 + $0x10] sm:$0xff]  ;;  %v15_v26 = vld [vmem:[%s1177_s0 + $0x8] sm:$0xff] }
   0xa   :  { %72 = vmatpush.msra.mxu0 %v26_v5  ;;  %v860_v27 = vld [vmem:[%s1177_s0] sm:$0xff]  ;;  %v35_v28 = vld [vmem:[%s1177_s0 + $0xa8] sm:$0xff]  ;;  %v33_v30 = vld [vmem:[%s1177_s0 + $0x98] sm:$0xff] }
   0xb   :  { %93 = vmatpush.msra.mxu1 %v42_v11  ;;  %v34_v29 = vld [vmem:[%s1177_s0 + $0xa0] sm:$0xff]  ;;  %v32_v31 = vld [vmem:[%s1177_s0 + $0x90] sm:$0xff]  ;;  %v31_v32 = vld [vmem:[%s1177_s0 + $0x88] sm:$0xff] }
   0xc   :  { %73 = vmatpush.msra.mxu0 %v25_v8  ;;  %v62_v33 = vld [vmem:[%s1177_s0 + $0x180] sm:$0xff]  ;;  %v61_v34 = vld [vmem:[%s1177_s0 + $0x178] sm:$0xff]  ;;  %v60_v35 = vld [vmem:[%s1177_s0 + $0x170] sm:$0xff] }
   0xd   :  { %94 = vmatpush.msra.mxu1 %v41_v13  ;;  %113 = vmatpush.msra.mxu2 %v62_v33  ;;  %v59_v36 = vld [vmem:[%s1177_s0 + $0x168] sm:$0xff]  ;;  %v58_v37 = vld [vmem:[%s1177_s0 + $0x160] sm:$0xff]  ;;  %v57_v38 = vld [vmem:[%s1177_s0 + $0x158] sm:$0xff] }
   0xe   :  { %74 = vmatpush.msra.mxu0 %v24_v9  ;;  %v56_v39 = vld [vmem:[%s1177_s0 + $0x150] sm:$0xff]  ;;  %v55_v40 = vld [vmem:[%s1177_s0 + $0x148] sm:$0xff]  ;;  %v54_v41 = vld [vmem:[%s1177_s0 + $0x140] sm:$0xff] }
   0xf   :  { %95 = vmatpush.msra.mxu1 %v40_v15  ;;  %114 = vmatpush.msra.mxu2 %v61_v34  ;;  %v53_v42 = vld [vmem:[%s1177_s0 + $0x138] sm:$0xff]  ;;  %v52_v43 = vld [vmem:[%s1177_s0 + $0x130] sm:$0xff]  ;;  %v720_v44 = vld [vmem:[%s1178_s1] ss:$0 sm:$0xff] }
  0x10   :  { %75 = vmatpush.msra.mxu0 %v23_v12  ;;  %v51_v45 = vld [vmem:[%s1177_s0 + $0x128] sm:$0xff]  ;;  %v50_v47 = vld [vmem:[%s1177_s0 + $0x120] sm:$0xff]  ;;  %v49_v50 = vld [vmem:[%s1177_s0 + $0x118] sm:$0xff] }
  0x11   :  { %96 = vmatpush.msra.mxu1 %v39_v17  ;;  %115 = vmatpush.msra.mxu2 %v60_v35  ;;  %v48_v51 = vld [vmem:[%s1177_s0 + $0x110] sm:$0xff]  ;;  %v47_v52 = vld [vmem:[%s1177_s0 + $0x108] sm:$0xff]  ;;  %v932_v53 = vld [vmem:[%s1179_s2 + $0x38] sm:$0xff] }
  0x12   :  { %76 = vmatpush.msra.mxu0 %v22_v14  ;;  %203 = vmatpush.bf16.msra.mxu3 %v932_v53  ;;  %v938_v54 = vld [vmem:[%s1179_s2 + $0x30] sm:$0xff]  ;;  %v945_v55 = vld [vmem:[%s1179_s2 + $0x28] sm:$0xff]  ;;  %v952_v56 = vld [vmem:[%s1179_s2 + $0x20] sm:$0xff] }
  0x13   :  { %97 = vmatpush.msra.mxu1 %v38_v19  ;;  %116 = vmatpush.msra.mxu2 %v59_v36  ;;  %v959_v57 = vld [vmem:[%s1179_s2 + $0x18] sm:$0xff]  ;;  %v722_v58 = vld [vmem:[%s1178_s1 + $0x1] ss:$0 sm:$0xff]  ;;  %v974_v62 = vld [vmem:[%s1179_s2 + $0x10] sm:$0xff] }
  0x14   :  { %77 = vmatpush.msra.mxu0 %v21_v16  ;;  %v981_v63 = vld [vmem:[%s1179_s2 + $0x8] sm:$0xff]  ;;  %v987_v0 = vld [vmem:[%s1179_s2] sm:$0xff]  ;;  %v997_v1 = vld [vmem:[%s1179_s2 + $0x78] sm:$0xff] }
  0x15   :  { %98 = vmatpush.msra.mxu1 %v37_v21  ;;  %117 = vmatpush.msra.mxu2 %v58_v37  ;;  %v1003_v2 = vld [vmem:[%s1179_s2 + $0x70] sm:$0xff]  ;;  %v1012_v3 = vld [vmem:[%s1179_s2 + $0x68] sm:$0xff]  ;;  %v1021_v4 = vld [vmem:[%s1179_s2 + $0x60] sm:$0xff] }
  0x16   :  { %78 = vmatpush.msra.mxu0 %v20_v18  ;;  %204 = vmatpush.bf16.msra.mxu3 %v938_v54  ;;  %v1030_v5 = vld [vmem:[%s1179_s2 + $0x58] sm:$0xff]  ;;  %v723_v6 = vld [vmem:[%s1178_s1 + $0x2] ss:$0 sm:$0xff]  ;;  %v1057_v11 = vld [vmem:[%s1179_s2 + $0x50] sm:$0xff] }
  0x17   :  { %99 = vmatpush.msra.mxu1 %v36_v23  ;;  %118 = vmatpush.msra.mxu2 %v57_v38  ;;  %v1064_v12 = vld [vmem:[%s1179_s2 + $0x48] sm:$0xff]  ;;  %v1071_v13 = vld [vmem:[%s1179_s2 + $0x40] sm:$0xff] }
  0x18   :  { %79 = vmatpush.msra.mxu0 %v19_v20  ;;  %v1088_v14 = vld [vmem:[%s1178_s1 + $0x3] ss:$0 sm:$0xff]  ;;  %v1108_v20 = vld [vmem:[%s1178_s1 + $0x4] ss:$0 sm:$0xff] }
  0x19   :  { %100 = vmatpush.msra.mxu1 %v35_v28  ;;  %119 = vmatpush.msra.mxu2 %v56_v39 }
  0x1a   :  { %80 = vmatpush.msra.mxu0 %v18_v22  ;;  %205 = vmatpush.bf16.msra.mxu3 %v945_v55 }
  0x1b   :  { %101 = vmatpush.msra.mxu1 %v34_v29  ;;  %120 = vmatpush.msra.mxu2 %v55_v40 }
  0x1c   :  { %81 = vmatpush.msra.mxu0 %v17_v24 }
  0x1d   :  { %102 = vmatpush.msra.mxu1 %v33_v30  ;;  %121 = vmatpush.msra.mxu2 %v54_v41 }
  0x1e   :  { %82 = vmatpush.msra.mxu0 %v16_v25  ;;  %206 = vmatpush.bf16.msra.mxu3 %v952_v56 }
  0x1f   :  { %103 = vmatpush.msra.mxu1 %v32_v31  ;;  %122 = vmatpush.msra.mxu2 %v53_v42 }
  0x20   :  { %83 = vmatpush.msra.mxu0 %v15_v26 }
  0x21   :  { %84 = vmatmul.f32.vlgmr.msra.gmra.mxu0 %v860_v27  ;;  %104 = vmatpush.msra.mxu1 %v31_v32 }
  0x22   :  { %123 = vmatpush.msra.mxu2 %v52_v43  ;;  %207 = vmatpush.bf16.msra.mxu3 %v959_v57 }
  0x23   :  { %301 = vmatpush.bf16.msrb.mxu1 %v932_v53  ;;  %284 = vmatpush.bf16.msrb.mxu0 %v997_v1 }
  0x24   :  { %124 = vmatpush.msra.mxu2 %v51_v45 }
  0x26   :  { %125 = vmatpush.msra.mxu2 %v50_v47  ;;  %208 = vmatpush.bf16.msra.mxu3 %v974_v62 }
  0x27   :  { %302 = vmatpush.bf16.msrb.mxu1 %v938_v54  ;;  %285 = vmatpush.bf16.msrb.mxu0 %v1003_v2 }
  0x28   :  { %126 = vmatpush.msra.mxu2 %v49_v50 }
  0x2a   :  { %127 = vmatpush.msra.mxu2 %v48_v51  ;;  %209 = vmatpush.bf16.msra.mxu3 %v981_v63 }
  0x2b   :  { %303 = vmatpush.bf16.msrb.mxu1 %v945_v55  ;;  %286 = vmatpush.bf16.msrb.mxu0 %v1012_v3 }
  0x2c   :  { %128 = vmatpush.msra.mxu2 %v47_v52 }
  0x2e   :  { %210 = vmatpush.bf16.msra.mxu3 %v987_v0  ;;  %317 = vmatpush.bf16.msrb.mxu2 %v997_v1 }
  0x2f   :  { %304 = vmatpush.bf16.msrb.mxu1 %v952_v56  ;;  %287 = vmatpush.bf16.msrb.mxu0 %v1021_v4 }
  0x32   :  { %334 = vmatpush.bf16.msrb.mxu3 %v932_v53  ;;  %318 = vmatpush.bf16.msrb.mxu2 %v1003_v2 }
  0x33   :  { %305 = vmatpush.bf16.msrb.mxu1 %v959_v57  ;;  %288 = vmatpush.bf16.msrb.mxu0 %v1030_v5 }
  0x36   :  { %335 = vmatpush.bf16.msrb.mxu3 %v938_v54  ;;  %319 = vmatpush.bf16.msrb.mxu2 %v1012_v3 }
  0x37   :  { %306 = vmatpush.bf16.msrb.mxu1 %v974_v62  ;;  %289 = vmatpush.bf16.msrb.mxu0 %v1057_v11 }
  0x3a   :  { %336 = vmatpush.bf16.msrb.mxu3 %v945_v55  ;;  %320 = vmatpush.bf16.msrb.mxu2 %v1021_v4 }
  0x3b   :  { %307 = vmatpush.bf16.msrb.mxu1 %v981_v63  ;;  %290 = vmatpush.bf16.msrb.mxu0 %v1064_v12 }
  0x3e   :  { %337 = vmatpush.bf16.msrb.mxu3 %v952_v56  ;;  %321 = vmatpush.bf16.msrb.mxu2 %v1030_v5 }
  0x3f   :  { %308 = vmatpush.bf16.msrb.mxu1 %v987_v0  ;;  %291 = vmatpush.bf16.msrb.mxu0 %v1071_v13 }
  0x42   :  { %338 = vmatpush.bf16.msrb.mxu3 %v959_v57  ;;  %322 = vmatpush.bf16.msrb.mxu2 %v1057_v11 }
  0x43   :  { %350 = vmatpush.bf16.msra.mxu0 %v997_v1 }
  0x46   :  { %339 = vmatpush.bf16.msrb.mxu3 %v974_v62  ;;  %323 = vmatpush.bf16.msrb.mxu2 %v1064_v12 }
  0x47   :  { %351 = vmatpush.bf16.msra.mxu0 %v1003_v2 }
  0x4a   :  { %340 = vmatpush.bf16.msrb.mxu3 %v981_v63  ;;  %324 = vmatpush.bf16.msrb.mxu2 %v1071_v13 }
  0x4b   :  { %352 = vmatpush.bf16.msra.mxu0 %v1012_v3 }
  0x4e   :  { %341 = vmatpush.bf16.msrb.mxu3 %v987_v0 }
  0x4f   :  { %353 = vmatpush.bf16.msra.mxu0 %v1021_v4 }
  0x53   :  { %354 = vmatpush.bf16.msra.mxu0 %v1030_v5 }
  0x57   :  { %355 = vmatpush.bf16.msra.mxu0 %v1057_v11 }
  0x5b   :  { %356 = vmatpush.bf16.msra.mxu0 %v1064_v12 }
  0x5f   :  { %357 = vmatpush.bf16.msra.mxu0 %v1071_v13 }
  0x9e   :  { %v85_v46 = vpop.f32.mrf.mxu0 }
  0x9f   :  { %v86_v48 = vadd.f32 %v720_v44, %v85_v46 }
  0xa1   :  { %726 = vtanh.f32 %v86_v48 }
  0xa7   :  { %v727_v49 = vpop.eup %726 }
  0xa8   :  { %105 = vmatmul.f32.vlgmr.msra.gmra.mxu1 %v727_v49 }
  0xa9   :  { %367 = vmatpush.bf16.msra.mxu1 %v932_v53 }
  0xad   :  { %368 = vmatpush.bf16.msra.mxu1 %v938_v54 }
  0xb1   :  { %369 = vmatpush.bf16.msra.mxu1 %v945_v55 }
  0xb5   :  { %370 = vmatpush.bf16.msra.mxu1 %v952_v56 }
  0xb9   :  { %371 = vmatpush.bf16.msra.mxu1 %v959_v57 }
  0xbd   :  { %372 = vmatpush.bf16.msra.mxu1 %v974_v62 }
  0xc1   :  { %373 = vmatpush.bf16.msra.mxu1 %v981_v63 }
  0xc5   :  { %374 = vmatpush.bf16.msra.mxu1 %v987_v0 }
 0x125   :  { %v106_v59 = vpop.f32.mrf.mxu1 }
 0x126   :  { %v109_v60 = vadd.f32 %v106_v59, %v860_v27 }
 0x128   :  { %v968_v61 = vadd.f32 %v722_v58, %v109_v60 }
 0x12a   :  { %129 = vmatmul.f32.vlgmr.msra.gmra.mxu2 %v968_v61 }
 0x12b   :  { %383 = vmatpush.bf16.msra.mxu2 %v997_v1 }
 0x12f   :  { %384 = vmatpush.bf16.msra.mxu2 %v1003_v2 }
 0x133   :  { %385 = vmatpush.bf16.msra.mxu2 %v1012_v3 }
 0x137   :  { %386 = vmatpush.bf16.msra.mxu2 %v1021_v4 }
 0x13b   :  { %387 = vmatpush.bf16.msra.mxu2 %v1030_v5 }
 0x13f   :  { %388 = vmatpush.bf16.msra.mxu2 %v1057_v11 }
 0x143   :  { %389 = vmatpush.bf16.msra.mxu2 %v1064_v12 }
 0x147   :  { %390 = vmatpush.bf16.msra.mxu2 %v1071_v13 }
 0x1ad   :  { %v130_v7 = vpop.f32.mrf.mxu2 }
 0x1ae   :  { %v131_v8 = vadd.f32 %v723_v6, %v130_v7 }
 0x1b0   :  { %728 = vtanh.f32 %v131_v8 }
 0x1b6   :  { %v729_v9 = vpop.eup %728 }
 0x1b7   :  { %v138_v10 = vpack.c.bf16 %v729_v9, %v729_v9 }
 0x1b9   :  { %211 = vmatmul.bf16.vlgmr.msra.gmra.mxu3 %v138_v10 }
 0x1ba   :  { %400 = vmatpush.bf16.msra.mxu3 %v932_v53 }
 0x1be   :  { %401 = vmatpush.bf16.msra.mxu3 %v938_v54 }
 0x1c2   :  { %402 = vmatpush.bf16.msra.mxu3 %v945_v55 }
 0x1c6   :  { %403 = vmatpush.bf16.msra.mxu3 %v952_v56 }
 0x1ca   :  { %404 = vmatpush.bf16.msra.mxu3 %v959_v57 }
 0x1ce   :  { %405 = vmatpush.bf16.msra.mxu3 %v974_v62 }
 0x1d2   :  { %406 = vmatpush.bf16.msra.mxu3 %v981_v63 }
 0x1d6   :  { %407 = vmatpush.bf16.msra.mxu3 %v987_v0 }
 0x23c   :  { %v212_v15 = vpop.f32.mrf.mxu3 }
 0x23d   :  { %v213_v16 = vadd.f32 %v1088_v14, %v212_v15 }
 0x23f   :  { %730 = vtanh.f32 %v213_v16 }
 0x244   :  { %v214_v17 = vpop.f32.mrf.mxu3 }
 0x245   :  { %v731_v18 = vpop.eup %730 }
 0x246   :  { %v218_v19 = vpack.c.bf16 %v731_v18, %v731_v18 }
 0x248   :  { %292 = vmatmul.bf16.vlgmr.msrb.gmra.mxu0 %v218_v19  ;;  %v719_v19 = vld [vmem:[%s1179_s2 + $0xb8] sm:$0xff] }
 0x249   :  { %416 = vmatpush.bf16.msrb.mxu0 %v997_v1 }
 0x24d   :  { %417 = vmatpush.bf16.msrb.mxu0 %v1003_v2 }
 0x251   :  { %418 = vmatpush.bf16.msrb.mxu0 %v1012_v3 }
 0x255   :  { %419 = vmatpush.bf16.msrb.mxu0 %v1021_v4 }
 0x259   :  { %420 = vmatpush.bf16.msrb.mxu0 %v1030_v5 }
 0x25d   :  { %421 = vmatpush.bf16.msrb.mxu0 %v1057_v11 }
 0x261   :  { %422 = vmatpush.bf16.msrb.mxu0 %v1064_v12 }
 0x265   :  { %423 = vmatpush.bf16.msrb.mxu0 %v1071_v13 }
 0x2c5   :  { %v293_v21 = vpop.f32.mrf.mxu0 }
 0x2c6   :  { %v297_v22 = vadd.f32 %v293_v21, %v131_v8  ;;  %v718_v21 = vld [vmem:[%s1179_s2 + $0xb0] sm:$0xff] }
 0x2c8   :  { %v298_v23 = vadd.f32 %v1108_v20, %v297_v22  ;;  %v717_v22 = vld [vmem:[%s1179_s2 + $0xa8] sm:$0xff] }
 0x2ca   :  { %732 = vtanh.f32 %v298_v23 }
 0x2cd   :  { %v295_v24 = vpop.f32.mrf.mxu0 }
 0x2ce   :  { %v715_v24 = vld [vmem:[%s1179_s2 + $0x98] sm:$0xff] }
 0x2d0   :  { %v733_v25 = vpop.eup %732 }
 0x2d1   :  { %v300_v26 = vpack.c.bf16 %v733_v25, %v733_v25 }
 0x2d3   :  { %309 = vmatmul.bf16.vlgmr.msrb.gmra.mxu1 %v300_v26 }
 0x2d4   :  { %433 = vmatpush.bf16.msrb.mxu1 %v932_v53 }
 0x2d8   :  { %434 = vmatpush.bf16.msrb.mxu1 %v938_v54 }
 0x2dc   :  { %435 = vmatpush.bf16.msrb.mxu1 %v945_v55 }
 0x2e0   :  { %436 = vmatpush.bf16.msrb.mxu1 %v952_v56 }
 0x2e4   :  { %437 = vmatpush.bf16.msrb.mxu1 %v959_v57 }
 0x2e8   :  { %438 = vmatpush.bf16.msrb.mxu1 %v974_v62 }
 0x2ec   :  { %439 = vmatpush.bf16.msrb.mxu1 %v981_v63 }
 0x2f0   :  { %440 = vmatpush.bf16.msrb.mxu1 %v987_v0 }
 0x350   :  { %v310_v27 = vpop.f32.mrf.mxu1 }
 0x351   :  { %v311_v28 = vadd.f32 %v1088_v14, %v310_v27 }
 0x353   :  { %734 = vtanh.f32 %v311_v28 }
 0x358   :  { %v312_v29 = vpop.f32.mrf.mxu1 }
 0x359   :  { %v735_v30 = vpop.eup %734 }
 0x35a   :  { %v316_v31 = vpack.c.bf16 %v735_v30, %v735_v30  ;;  %v315_v40 = vadd.f32 %v735_v30, %v731_v18 }
 0x35c   :  { %325 = vmatmul.bf16.vlgmr.msrb.gmra.mxu2 %v316_v31  ;;  %v714_v31 = vld [vmem:[%s1179_s2 + $0x90] sm:$0xff] }
 0x35d   :  { %449 = vmatpush.bf16.msrb.mxu2 %v997_v1 }
 0x361   :  { %450 = vmatpush.bf16.msrb.mxu2 %v1003_v2 }
 0x365   :  { %451 = vmatpush.bf16.msrb.mxu2 %v1012_v3 }
 0x369   :  { %452 = vmatpush.bf16.msrb.mxu2 %v1021_v4 }
 0x36d   :  { %453 = vmatpush.bf16.msrb.mxu2 %v1030_v5 }
 0x371   :  { %454 = vmatpush.bf16.msrb.mxu2 %v1057_v11 }
 0x375   :  { %455 = vmatpush.bf16.msrb.mxu2 %v1064_v12 }
 0x379   :  { %456 = vmatpush.bf16.msrb.mxu2 %v1071_v13 }
 0x3df   :  { %v326_v32 = vpop.f32.mrf.mxu2 }
 0x3e0   :  { %v330_v33 = vadd.f32 %v326_v32, %v298_v23  ;;  %v716_v23 = vld [vmem:[%s1179_s2 + $0xa0] sm:$0xff]  ;;  %v713_v32 = vld [vmem:[%s1179_s2 + $0x88] sm:$0xff] }
 0x3e2   :  { %v331_v34 = vadd.f32 %v1108_v20, %v330_v33  ;;  %v712_v33 = vld [vmem:[%s1179_s2 + $0x80] sm:$0xff] }
 0x3e4   :  { %736 = vtanh.f32 %v331_v34 }
 0x3e7   :  { %v328_v35 = vpop.f32.mrf.mxu2 }
 0x3ea   :  { %v737_v36 = vpop.eup %736 }
 0x3eb   :  { %v333_v37 = vpack.c.bf16 %v737_v36, %v737_v36 }
 0x3ed   :  { %342 = vmatmul.bf16.vlgmr.msrb.gmra.mxu3 %v333_v37 }
 0x3ee   :  { %466 = vmatpush.bf16.msrb.mxu3 %v932_v53 }
 0x3f2   :  { %467 = vmatpush.bf16.msrb.mxu3 %v938_v54 }
 0x3f6   :  { %468 = vmatpush.bf16.msrb.mxu3 %v945_v55 }
 0x3fa   :  { %469 = vmatpush.bf16.msrb.mxu3 %v952_v56 }
 0x3fe   :  { %470 = vmatpush.bf16.msrb.mxu3 %v959_v57 }
 0x402   :  { %471 = vmatpush.bf16.msrb.mxu3 %v974_v62 }
 0x406   :  { %472 = vmatpush.bf16.msrb.mxu3 %v981_v63 }
 0x40a   :  { %473 = vmatpush.bf16.msrb.mxu3 %v987_v0 }
 0x470   :  { %v343_v38 = vpop.f32.mrf.mxu3 }
 0x471   :  { %v344_v39 = vadd.f32 %v1088_v14, %v343_v38 }
 0x473   :  { %738 = vtanh.f32 %v344_v39  ;;  %v725_v39 = vld [vmem:[%s1178_s1 + $0x5] ss:$0 sm:$0xff] }
 0x478   :  { %v345_v41 = vpop.f32.mrf.mxu3 }
 0x479   :  { %v739_v42 = vpop.eup %738 }
 0x47a   :  { %v348_v43 = vadd.f32 %v739_v42, %v315_v40  ;;  %v349_v44 = vpack.c.bf16 %v739_v42, %v739_v42 }
 0x47c   :  { %358 = vmatmul.bf16.vlgmr.msra.gmra.mxu0 %v349_v44 }
 0x47d   :  { %547 = vmatpush.bf16.msra.mxu0 %v719_v19 }
 0x481   :  { %548 = vmatpush.bf16.msra.mxu0 %v718_v21 }
 0x485   :  { %549 = vmatpush.bf16.msra.mxu0 %v717_v22 }
 0x489   :  { %550 = vmatpush.bf16.msra.mxu0 %v716_v23 }
 0x48d   :  { %551 = vmatpush.bf16.msra.mxu0 %v715_v24 }
 0x491   :  { %552 = vmatpush.bf16.msra.mxu0 %v714_v31 }
 0x495   :  { %553 = vmatpush.bf16.msra.mxu0 %v713_v32 }
 0x499   :  { %554 = vmatpush.bf16.msra.mxu0 %v712_v33 }
 0x4f9   :  { %v359_v45 = vpop.f32.mrf.mxu0 }
 0x4fa   :  { %v363_v46 = vadd.f32 %v359_v45, %v331_v34 }
 0x4fc   :  { %v364_v47 = vadd.f32 %v1108_v20, %v363_v46 }
 0x4fe   :  { %740 = vtanh.f32 %v364_v47 }
 0x501   :  { %v361_v48 = vpop.f32.mrf.mxu0 }
 0x504   :  { %v741_v49 = vpop.eup %740 }
 0x505   :  { %v366_v50 = vpack.c.bf16 %v741_v49, %v741_v49 }
 0x507   :  { %375 = vmatmul.bf16.vlgmr.msra.gmra.mxu1 %v366_v50 }
 0x584   :  { %v376_v51 = vpop.f32.mrf.mxu1 }
 0x585   :  { %v377_v52 = vadd.f32 %v1088_v14, %v376_v51 }
 0x587   :  { %742 = vtanh.f32 %v377_v52 }
 0x58c   :  { %v378_v53 = vpop.f32.mrf.mxu1 }
 0x58d   :  { %v743_v54 = vpop.eup %742 }
 0x58e   :  { %v381_v55 = vadd.f32 %v743_v54, %v348_v43  ;;  %v382_v56 = vpack.c.bf16 %v743_v54, %v743_v54 }
 0x590   :  { %391 = vmatmul.bf16.vlgmr.msra.gmra.mxu2 %v382_v56 }
 0x613   :  { %v392_v57 = vpop.f32.mrf.mxu2 }
 0x614   :  { %v396_v58 = vadd.f32 %v392_v57, %v364_v47 }
 0x616   :  { %v397_v59 = vadd.f32 %v1108_v20, %v396_v58 }
 0x618   :  { %744 = vtanh.f32 %v397_v59 }
 0x61b   :  { %v394_v60 = vpop.f32.mrf.mxu2 }
 0x61e   :  { %v745_v62 = vpop.eup %744 }
 0x61f   :  { %v399_v63 = vpack.c.bf16 %v745_v62, %v745_v62 }
 0x621   :  { %408 = vmatmul.bf16.vlgmr.msra.gmra.mxu3 %v399_v63 }
 0x6a4   :  { %v409_v0 = vpop.f32.mrf.mxu3 }
 0x6a5   :  { %v410_v1 = vadd.f32 %v1088_v14, %v409_v0 }
 0x6a7   :  { %746 = vtanh.f32 %v410_v1 }
 0x6ac   :  { %v411_v2 = vpop.f32.mrf.mxu3 }
 0x6ad   :  { %v747_v3 = vpop.eup %746 }
 0x6ae   :  { %v414_v4 = vadd.f32 %v747_v3, %v381_v55  ;;  %v415_v5 = vpack.c.bf16 %v747_v3, %v747_v3 }
 0x6b0   :  { %424 = vmatmul.bf16.vlgmr.msrb.gmra.mxu0 %v415_v5 }
 0x72d   :  { %v425_v6 = vpop.f32.mrf.mxu0 }
 0x72e   :  { %v429_v7 = vadd.f32 %v425_v6, %v397_v59 }
 0x730   :  { %v430_v8 = vadd.f32 %v1108_v20, %v429_v7 }
 0x732   :  { %748 = vtanh.f32 %v430_v8 }
 0x735   :  { %v427_v9 = vpop.f32.mrf.mxu0 }
 0x738   :  { %v749_v10 = vpop.eup %748 }
 0x739   :  { %v432_v11 = vpack.c.bf16 %v749_v10, %v749_v10 }
 0x73b   :  { %441 = vmatmul.bf16.vlgmr.msrb.gmra.mxu1 %v432_v11 }
 0x7b8   :  { %v442_v12 = vpop.f32.mrf.mxu1 }
 0x7b9   :  { %v443_v13 = vadd.f32 %v1088_v14, %v442_v12 }
 0x7bb   :  { %750 = vtanh.f32 %v443_v13 }
 0x7c0   :  { %v444_v15 = vpop.f32.mrf.mxu1 }
 0x7c1   :  { %v751_v16 = vpop.eup %750 }
 0x7c2   :  { %v447_v17 = vadd.f32 %v751_v16, %v414_v4  ;;  %v448_v18 = vpack.c.bf16 %v751_v16, %v751_v16 }
 0x7c4   :  { %457 = vmatmul.bf16.vlgmr.msrb.gmra.mxu2 %v448_v18 }
 0x847   :  { %v458_v25 = vpop.f32.mrf.mxu2 }
 0x848   :  { %v462_v26 = vadd.f32 %v458_v25, %v430_v8 }
 0x84a   :  { %v463_v27 = vadd.f32 %v1108_v20, %v462_v26 }
 0x84c   :  { %752 = vtanh.f32 %v463_v27 }
 0x84f   :  { %v460_v28 = vpop.f32.mrf.mxu2 }
 0x852   :  { %v753_v29 = vpop.eup %752 }
 0x853   :  { %v465_v30 = vpack.c.bf16 %v753_v29, %v753_v29 }
 0x855   :  { %474 = vmatmul.bf16.vlgmr.msrb.gmra.mxu3 %v465_v30 }
 0x8d8   :  { %v475_v20 = vpop.f32.mrf.mxu3 }
 0x8d9   :  { %v476_v34 = vadd.f32 %v1088_v14, %v475_v20 }
 0x8db   :  { %754 = vtanh.f32 %v476_v34 }
 0x8e0   :  { %v477_v35 = vpop.f32.mrf.mxu3 }
 0x8e1   :  { %v755_v36 = vpop.eup %754 }
 0x8e2   :  { %v480_v37 = vadd.f32 %v755_v36, %v447_v17 }
 0x8e4   :  { %v481_v38 = vpack.c.bf16 %v480_v37, %v480_v37 }
 0x8e6   :  { %555 = vmatmul.bf16.vlgmr.msra.gmra.mxu0 %v481_v38 }
 0x963   :  { %v556_v40 = vpop.f32.mrf.mxu0 }
 0x964   :  { %v560_v41 = vadd.f32 %v556_v40, %v968_v61 }
 0x966   :  { %v562_v42 = vadd.f32 %v725_v39, %v560_v41 }
 0x968   :  { %563 = vst [vmem:[%s1180_s3] sm:$0xff] %v562_v42 }
 0x96b   :  { %v558_v43 = vpop.f32.mrf.mxu0 }

</bundles_post_ra>
